<compile_context>
chip_gen: v5e
topology: v5e:2x2
jax: 0.10.0
libtpu: 0.0.40
codegen_flags: <defaults>
</compile_context>

<pallas_src>
import functools

import jax
import jax.numpy as jnp
from jax.experimental import pallas as pl
from jax.experimental.pallas import tpu as pltpu


def _round_up(x: int, m: int) -> int:
    return ((x + m - 1) // m) * m


def _largest_tile(total: int, cap: int, unit: int = 128) -> int:
    """Largest multiple of `unit` that divides `total` and is <= cap (>= unit)."""
    cap = max(unit, (min(cap, total) // unit) * unit)
    t = cap
    while total % t:
        t -= unit
    return t


def _linear_kernel(x_ref, w_ref, b_ref, o_ref, acc_ref):
    """x_ref: (tm, tk), w_ref: (tk, tn)  [pre-transposed (F,O) weight], b_ref: (1, tn)."""
    k = pl.program_id(2)

    @pl.when(k == 0)
    def _init():
        # Fold the bias into the accumulator init: no separate epilogue add.
        acc_ref[...] = jnp.broadcast_to(
            b_ref[...].astype(jnp.float32), acc_ref.shape)

    # Plain NN matmul on the MXU; weight was transposed once at init, so no
    # per-step XLU transpose can be emitted.
    acc_ref[...] += jnp.dot(x_ref[...], w_ref[...],
                            preferred_element_type=jnp.float32)

    @pl.when(k == pl.num_programs(2) - 1)
    def _finalize():
        o_ref[...] = acc_ref[...].astype(o_ref.dtype)


@functools.partial(
    jax.jit,
    static_argnames=("out_features", "tm", "tn", "tk",
                     "compute_dtype", "out_dtype", "vmem_limit"))
def _linear_forward(x, w_t, b_row, *, out_features, tm, tn, tk,
                    compute_dtype, out_dtype, vmem_limit):
    B = x.shape[0]
    F = 1
    for s in x.shape[1:]:
        F *= s
    Fp, Op = w_t.shape
    O = out_features

    # == torch: x.view(-1, num_flat_features(x)); cast to compute dtype per call.
    x2 = x.reshape(B, F).astype(compute_dtype)
    if F != Fp:
        # Only the K (reduction) dim ever needs true zero padding: garbage there
        # would reach valid outputs through the accumulator.  M is never padded.
        x2 = jnp.pad(x2, ((0, 0), (0, Fp - F)))

    grid_m = pl.cdiv(B, tm)      # partial edge block on M handled by Pallas
    grid_n = Op // tn
    grid_k = Fp // tk

    ci = jnp.dtype(compute_dtype).itemsize
    oi = jnp.dtype(out_dtype).itemsize
    cost = pl.CostEstimate(
        flops=2 * B * Fp * Op,
        transcendentals=0,
        bytes_accessed=(grid_n * B * Fp * ci       # x re-read once per N tile
                        + grid_m * Fp * Op * ci    # W re-read once per M tile
                        + B * O * oi               # output written once
                        + Op * 4),                 # bias
    )

    return pl.pallas_call(
        _linear_kernel,
        out_shape=jax.ShapeDtypeStruct((B, O), out_dtype),
        grid_spec=pltpu.PrefetchScalarGridSpec(
            num_scalar_prefetch=0,
            grid=(grid_m, grid_n, grid_k),
            in_specs=[
                pl.BlockSpec((tm, tk), lambda i, j, k: (i, k)),   # x tile
                pl.BlockSpec((tk, tn), lambda i, j, k: (k, j)),   # W^T tile (F,O)
                pl.BlockSpec((1, tn), lambda i, j, k: (0, j)),    # bias tile
            ],
            out_specs=pl.BlockSpec((tm, tn), lambda i, j, k: (i, j)),
            scratch_shapes=[pltpu.VMEM((tm, tn), jnp.float32)],
        ),
        compiler_params=pltpu.CompilerParams(
            dimension_semantics=("parallel", "parallel", "arbitrary"),
            vmem_limit_bytes=vmem_limit,
        ),
        cost_estimate=cost,
    )(x2, w_t, b_row)


class PallasLinear:
    """Pallas-TPU equivalent of the PyTorch `linear_model` module.

    All weight-side work (cast, transpose to (F, O), zero-pad to 128 multiples)
    is done ONCE here; the per-call path only reshapes/casts x.
    """

    _SUBLANE = {4: 8, 2: 16, 1: 32}   # min sublane tile per itemsize

    def __init__(self, weight, bias, *, compute_dtype=jnp.float32,
                 out_dtype=jnp.float32):
        O, F = weight.shape
        self.in_features = F
        self.out_features = O
        self.compute_dtype = compute_dtype
        self.out_dtype = out_dtype

        Fp = _round_up(F, 128)
        Op = _round_up(O, 128)
        w_t = jnp.asarray(weight, compute_dtype).T          # (F, O): NN layout
        if (Fp, Op) != (F, O):
            w_t = jnp.pad(w_t, ((0, Fp - F), (0, Op - O)))
        b_row = jnp.asarray(bias, jnp.float32).reshape(1, O)
        if Op != O:
            b_row = jnp.pad(b_row, ((0, 0), (0, Op - O)))
        self.w_t = w_t
        self.b_row = b_row
        self.Fp, self.Op = Fp, Op

        # Generation-aware tile caps, queried once (not per call).
        try:
            vmem_cap = pltpu.get_tpu_info().vmem_capacity_bytes
        except Exception:
            vmem_cap = 64 << 20            # assume smallest (v7x) if unknown
        if vmem_cap >= (100 << 20):        # v5e / v6e: 128 MiB physical VMEM
            self.tile_caps = (512, 1024, 2048)
        else:                              # v7x: 64 MiB physical VMEM
            self.tile_caps = (512, 512, 1024)

    def __call__(self, x):
        B = x.shape[0]
        tm_cap, tn_cap, tk_cap = self.tile_caps
        sub = max(self._SUBLANE[jnp.dtype(self.compute_dtype).itemsize],
                  self._SUBLANE[jnp.dtype(self.out_dtype).itemsize])
        # One M tile for the whole batch when it fits: W is then streamed from
        # HBM exactly once.
        tm = min(_round_up(B, sub), tm_cap)
        tn = _largest_tile(self.Op, tn_cap)
        tk = _largest_tile(self.Fp, tk_cap)

        # v7x shards the "parallel" grid axes over 2 TensorCores; keep at least
        # one parallel axis with extent >= 2 when the layer is big enough.
        if pl.cdiv(B, tm) == 1 and self.Op // tn == 1 and self.Op >= 256:
            tn = _largest_tile(self.Op, self.Op // 2)

        ci = jnp.dtype(self.compute_dtype).itemsize
        oi = jnp.dtype(self.out_dtype).itemsize
        vmem_needed = (2 * (tm * tk * ci + tk * tn * ci + tm * tn * oi + tn * 4)
                       + tm * tn * 4)
        vmem_limit = int(max(vmem_needed + (4 << 20), 32 << 20))

        return _linear_forward(
            x, self.w_t, self.b_row,
            out_features=self.out_features, tm=tm, tn=tn, tk=tk,
            compute_dtype=self.compute_dtype, out_dtype=self.out_dtype,
            vmem_limit=vmem_limit)


if __name__ == "__main__":
    # Small shapes consistent with the module: x = (2, 4, 4, 8) -> input_dim = 128
    B, C, H, W = 2, 4, 4, 8
    input_dim = C * H * W          # 128
    output_dim = 32

    key = jax.random.PRNGKey(0)
    kx, kw, kb = jax.random.split(key, 3)

    x = jax.random.normal(kx, (B, C, H, W), dtype=jnp.float32)

    # Deterministic nn.Linear-style init: U(-1/sqrt(F), 1/sqrt(F))
    bound = 1.0 / (input_dim ** 0.5)
    weight = jax.random.uniform(kw, (output_dim, input_dim), jnp.float32,
                                -bound, bound)
    bias = jax.random.uniform(kb, (output_dim,), jnp.float32, -bound, bound)

    ref = x.reshape(B, -1) @ weight.T + bias

    # f32 compute path
    model_f32 = PallasLinear(weight, bias, compute_dtype=jnp.float32)
    out_f32 = model_f32(x)
    jax.block_until_ready(out_f32)
    assert out_f32.shape == (B, output_dim)
    assert jnp.allclose(out_f32, ref, atol=1e-5, rtol=1e-5)

    # bf16 compute path (weight cast once at init, f32 accumulation)
    model_bf16 = PallasLinear(weight, bias, compute_dtype=jnp.bfloat16)
    out_bf16 = model_bf16(x)
    jax.block_until_ready(out_bf16)
    assert out_bf16.shape == (B, output_dim)
    assert jnp.allclose(out_bf16, ref, atol=3e-2, rtol=3e-2)

    print("KERNEL_OK")
</pallas_src>

<mosaic_0001>
module attributes {stable_mosaic.version = 11 : i64} {
  func.func @_linear_kernel(%arg0: i32, %arg1: i32, %arg2: i32, %arg3: memref<8x128xf32, #tpu.memory_space<vmem>>, %arg4: memref<128x128xf32, #tpu.memory_space<vmem>>, %arg5: memref<1x128xf32, #tpu.memory_space<vmem>>, %arg6: memref<8x128xf32, #tpu.memory_space<vmem>>, %arg7: memref<8x128xf32, #tpu.memory_space<vmem>>) attributes {dimension_semantics = [#tpu.dimension_semantics<parallel>, #tpu.dimension_semantics<parallel>, #tpu.dimension_semantics<arbitrary>], iteration_bounds = array<i64: 1, 1, 1>, scalar_prefetch = 0 : i64, scratch_operands = 1 : i64, tpu.core_type = #tpu.core_type<tc>, window_params = [{transform_indices = @transform_0, window_bounds = array<i64: 8, 128>}, {transform_indices = @transform_1, window_bounds = array<i64: 128, 128>}, {transform_indices = @transform_2, window_bounds = array<i64: 1, 128>}, {transform_indices = @transform_3, window_bounds = array<i64: 8, 128>}]} {
    %c0_i32 = arith.constant 0 : i32
    %0 = arith.cmpi eq, %arg2, %c0_i32 : i32
    %1 = arith.extui %0 : i1 to i32
    %c0_i32_0 = arith.constant 0 : i32
    %2 = arith.cmpi ne, %1, %c0_i32_0 : i32
    scf.if %2 {
      %c0_10 = arith.constant 0 : index
      %c0_11 = arith.constant 0 : index
      %12 = vector.load %arg5[%c0_10, %c0_11] : memref<1x128xf32, #tpu.memory_space<vmem>>, vector<1x128xf32>
      %13 = vector.shape_cast %12 : vector<1x128xf32> to vector<1x128xf32>
      %14 = vector.broadcast %13 : vector<1x128xf32> to vector<8x128xf32>
      %c0_12 = arith.constant 0 : index
      %c0_13 = arith.constant 0 : index
      %15 = vector.load %arg7[%c0_12, %c0_13] : memref<8x128xf32, #tpu.memory_space<vmem>>, vector<8x128xf32>
      tpu.vector_store %arg7[%c0_12, %c0_13], %14 {strides = array<i32>} : memref<8x128xf32, #tpu.memory_space<vmem>>, vector<8x128xf32>,
    } else {
    }
    %c0 = arith.constant 0 : index
    %c0_1 = arith.constant 0 : index
    %3 = vector.load %arg7[%c0, %c0_1] : memref<8x128xf32, #tpu.memory_space<vmem>>, vector<8x128xf32>
    %c0_2 = arith.constant 0 : index
    %c0_3 = arith.constant 0 : index
    %4 = vector.load %arg3[%c0_2, %c0_3] : memref<8x128xf32, #tpu.memory_space<vmem>>, vector<8x128xf32>
    %c0_4 = arith.constant 0 : index
    %c0_5 = arith.constant 0 : index
    %5 = vector.load %arg4[%c0_4, %c0_5] : memref<128x128xf32, #tpu.memory_space<vmem>>, vector<128x128xf32>
    %cst = arith.constant dense<0.000000e+00> : vector<8x128xf32>
    %6 = tpu.matmul %4, %5, %cst {dimension_numbers = #tpu.dot_dimension_numbers<[1], [0], [0], [1], [0, 0, 1, 1], [], []>} : vector<8x128xf32>, vector<128x128xf32>, vector<8x128xf32> -> vector<8x128xf32>
    %7 = arith.addf %3, %6 : vector<8x128xf32>
    %c0_6 = arith.constant 0 : index
    %c0_7 = arith.constant 0 : index
    %8 = vector.load %arg7[%c0_6, %c0_7] : memref<8x128xf32, #tpu.memory_space<vmem>>, vector<8x128xf32>
    tpu.vector_store %arg7[%c0_6, %c0_7], %7 {strides = array<i32>} : memref<8x128xf32, #tpu.memory_space<vmem>>, vector<8x128xf32>,
    %c0_i32_8 = arith.constant 0 : i32
    %9 = arith.cmpi eq, %arg2, %c0_i32_8 : i32
    %10 = arith.extui %9 : i1 to i32
    %c0_i32_9 = arith.constant 0 : i32
    %11 = arith.cmpi ne, %10, %c0_i32_9 : i32
    scf.if %11 {
      %c0_10 = arith.constant 0 : index
      %c0_11 = arith.constant 0 : index
      %12 = vector.load %arg7[%c0_10, %c0_11] : memref<8x128xf32, #tpu.memory_space<vmem>>, vector<8x128xf32>
      %c0_12 = arith.constant 0 : index
      %c0_13 = arith.constant 0 : index
      %13 = vector.load %arg6[%c0_12, %c0_13] : memref<8x128xf32, #tpu.memory_space<vmem>>, vector<8x128xf32>
      tpu.vector_store %arg6[%c0_12, %c0_13], %12 {strides = array<i32>} : memref<8x128xf32, #tpu.memory_space<vmem>>, vector<8x128xf32>,
    } else {
    }
    return
  }
  func.func @transform_0(%arg0: i32, %arg1: i32, %arg2: i32) -> (i32, i32) {
    %c0_i32 = arith.constant 0 : i32
    return %arg0, %arg2 : i32, i32
  }
  func.func @transform_1(%arg0: i32, %arg1: i32, %arg2: i32) -> (i32, i32) {
    %c0_i32 = arith.constant 0 : i32
    return %arg2, %arg1 : i32, i32
  }
  func.func @transform_2(%arg0: i32, %arg1: i32, %arg2: i32) -> (i32, i32) {
    %c0_i32 = arith.constant 0 : i32
    %c0_i32_0 = arith.constant 0 : i32
    return %c0_i32, %arg1 : i32, i32
  }
  func.func @transform_3(%arg0: i32, %arg1: i32, %arg2: i32) -> (i32, i32) {
    %c0_i32 = arith.constant 0 : i32
    return %arg0, %arg1 : i32, i32
  }
}

</mosaic_0001>

<bundles_post_ra>
// kernel: _linear_forward.1
= control target key start
LH: loop header
LB: loop body
LE: loop exit
PB: predicated region body
PF: predicated region fallthrough
CT: control target
= control target key end

     0   :  { %8 = vsyncpa [#allocation4], 0  ;;  %s201_s0 = inlined_call_operand.vmem [shape: f32[2,128], index: 0, kind: input, shape index: {}]   ;;  %s202_s1 = inlined_call_operand.hbm [shape: f32[128,128], index: 1, kind: input, shape index: {}]   ;;  %s203_s2 = inlined_call_operand.vmem [shape: f32[1,128], index: 2, kind: input, shape index: {}]   ;;  %s204_s3 = inlined_call_operand.hbm [shape: f32[2,32], index: 3, kind: output, shape index: {}]  }
   0x1   :  { %9 = vsyncpa [#allocation5], 0  ;;  %s16_s14 = sshll.u32 %s202_s1, 4  ;;  %s163_s15 = smov [#allocation3]   ;;  %s17_s14 = int_to_ptr.hbm [resolvable:$true] %s16_s14 }
   0x2   :  { %s18_s16 = sshll.u32 %s163_s15, 4  ;;  %s164_s17 = smov 128   ;;  %s19_s16 = int_to_ptr.vmem [resolvable:$true] %s18_s16 }
   0x3   :  { %s165_s18 = smov 8  }
   0x4   :  { %24 = dma.hbm_to_vmem [thread:$0]  %s17_s14, 2048, %s19_s16, [#allocation4], %s164_s17, %s164_s17, %s165_s18  }
   0x5   :  { %159 = dma.done.wait [#allocation4], 2048  }
   0x6   :  { %160 = vsyncadd [#allocation4], 4294965248  ;;  %v57_v0 = vld [vmem:[#allocation3 + $0x78] sm:$0xff]  ;;  %v56_v1 = vld [vmem:[#allocation3 + $0x70] sm:$0xff] }
   0x7   :  { %58 = vmatpush.msra.mxu0 %v57_v0  ;;  %v55_v2 = vld [vmem:[#allocation3 + $0x68] sm:$0xff]  ;;  %v54_v3 = vld [vmem:[#allocation3 + $0x60] sm:$0xff]  ;;  %v53_v4 = vld [vmem:[#allocation3 + $0x58] sm:$0xff] }
   0x8   :  { %v52_v5 = vld [vmem:[#allocation3 + $0x50] sm:$0xff]  ;;  %v51_v6 = vld [vmem:[#allocation3 + $0x48] sm:$0xff]  ;;  %v50_v7 = vld [vmem:[#allocation3 + $0x40] sm:$0xff] }
   0x9   :  { %59 = vmatpush.msra.mxu0 %v56_v1  ;;  %v49_v8 = vld [vmem:[#allocation3 + $0x38] sm:$0xff]  ;;  %v48_v9 = vld [vmem:[#allocation3 + $0x30] sm:$0xff]  ;;  %v47_v10 = vld [vmem:[#allocation3 + $0x28] sm:$0xff] }
   0xa   :  { %v46_v11 = vld [vmem:[#allocation3 + $0x20] sm:$0xff]  ;;  %v45_v12 = vld [vmem:[#allocation3 + $0x18] sm:$0xff]  ;;  %v44_v13 = vld [vmem:[#allocation3 + $0x10] sm:$0xff] }
   0xb   :  { %60 = vmatpush.msra.mxu0 %v55_v2  ;;  %v43_v14 = vld [vmem:[#allocation3 + $0x8] sm:$0xff]  ;;  %v42_v15 = vld [vmem:[#allocation3] sm:$0xff] }
   0xc   :  { %v41_v16 = vld [vmem:[%s201_s0] sm:$0xff] }
   0xd   :  { %61 = vmatpush.msra.mxu0 %v54_v3  ;;  %v110_v17 = vld [vmem:[%s203_s2] ss:$0 sm:$0xff] }
   0xf   :  { %62 = vmatpush.msra.mxu0 %v53_v4 }
  0x11   :  { %63 = vmatpush.msra.mxu0 %v52_v5 }
  0x13   :  { %64 = vmatpush.msra.mxu0 %v51_v6 }
  0x15   :  { %65 = vmatpush.msra.mxu0 %v50_v7 }
  0x17   :  { %66 = vmatpush.msra.mxu0 %v49_v8 }
  0x19   :  { %67 = vmatpush.msra.mxu0 %v48_v9 }
  0x1b   :  { %68 = vmatpush.msra.mxu0 %v47_v10 }
  0x1d   :  { %69 = vmatpush.msra.mxu0 %v46_v11 }
  0x1f   :  { %70 = vmatpush.msra.mxu0 %v45_v12 }
  0x21   :  { %71 = vmatpush.msra.mxu0 %v44_v13 }
  0x23   :  { %72 = vmatpush.msra.mxu0 %v43_v14 }
  0x25   :  { %73 = vmatpush.msra.mxu0 %v42_v15 }
  0x26   :  { %74 = vmatmul.f32.vlgmr.msra.gmra.mxu0 %v41_v16 }
  0xa3   :  { %v75_v18 = vpop.f32.mrf.mxu0 }
  0xa4   :  { %v78_v19 = vadd.f32 %v110_v17, %v75_v18 }
  0xa6   :  { %84 = vst [vmem:[#allocation6] sm:$0xff] %v78_v19 }
  0xa7   :  { %88 = vsyncadd [#allocation5], 96  ;;  %s91_s24 = sshll.u32 %s204_s3, 4  ;;  %s166_s25 = smov [#allocation6]   ;;  %s92_s24 = int_to_ptr.hbm [resolvable:$true] %s91_s24 }
  0xa8   :  { %s89_s26 = sshll.u32 %s166_s25, 4  ;;  %s167_s27 = smov 32   ;;  %s90_s26 = int_to_ptr.vmem [resolvable:$true] %s89_s26 }
  0xa9   :  { %s168_s0 = smov 2  }
  0xaa   :  { %97 = dma.vmem_to_hbm [thread:$0]  %s90_s26, 32, %s92_s24, [#allocation5], %s167_s27, %s167_s27, %s168_s0  }
  0xab   :  { %161 = dma.done.wait [#allocation5], 128  }
  0xac   :  { %162 = vsyncadd [#allocation5], 4294967168 }
  0xad   :  { %102 = vsyncpa [#allocation4], 1 }
  0xae   :  { %103 = vsyncpa [#allocation5], 1 }

</bundles_post_ra>
